<compile_context>
chip_gen: v7x
topology: tpu7x:2x2x1
jax: 0.10.0
libtpu: 0.0.40
codegen_flags: <defaults>
</compile_context>

<pallas_src>
import math
import functools

import jax
import jax.numpy as jnp
from jax.experimental import pallas as pl
from jax.experimental.pallas import tpu as pltpu


def _round_up(x, m):
    return ((x + m - 1) // m) * m


def _vmem_budget_bytes():
    """~75% of physical VMEM (~48 MiB on v7x's 64 MiB, ~96 MiB on v5e/v6e's 128 MiB)."""
    try:
        cap = int(pltpu.get_tpu_info().vmem_capacity_bytes)
    except Exception:
        cap = 64 * 2**20            # conservative fallback (v7x-sized)
    return (cap * 3) // 4


def _choose_tm(M, tm_cap, granule=256):
    """Pick the M-axis tile height TM and the padded M.

    Preference order:
      (a) a divisor of M (no pad + no output-slice HBM pass), MXU-granule
          aligned, giving an even tile count (keeps both v7x TensorCores busy);
      (b) any 8-aligned divisor of M;
      (c) fall back to padding M to a multiple of an aligned TM.
    """
    tm_cap = max(8, tm_cap - tm_cap % 8)
    if M <= tm_cap:
        # Whole M fits in one tile; still split in two for megacore when big.
        if M >= 2 * granule and M % 16 == 0:
            return M // 2, M
        return M, M
    best = None                      # (TM, score)
    for d in range(tm_cap, 7, -8):
        if M % d:
            continue
        score = (d % granule == 0, (M // d) % 2 == 0, d)
        if best is None or score > best[1]:
            best = (d, score)
    if best is not None:
        return best[0], M
    tm = tm_cap if tm_cap < granule else tm_cap - tm_cap % granule
    return tm, _round_up(M, tm)


def _block_spec(shape, index_map, buffer_count=None):
    """BlockSpec with an optional explicit pipeline depth (default: double buffer)."""
    if buffer_count is not None and buffer_count != 2:
        try:
            return pl.BlockSpec(
                shape, index_map,
                pipeline_mode=pl.Buffered(buffer_count=buffer_count))
        except TypeError:            # jax without BlockSpec.pipeline_mode
            pass
    return pl.BlockSpec(shape, index_map)


def _patch_embed_kernel(p_ref, w_ref, b_ref, o_ref):
    # p_ref: (TM, K_pad) streamed patch tile; w_ref: (K_pad, E_pad) resident
    # weight; b_ref: (1, E_pad) resident f32 bias; o_ref: (TM, E_pad) output.
    acc = jnp.dot(p_ref[...], w_ref[...], preferred_element_type=jnp.float32)
    o_ref[...] = (acc + b_ref[...]).astype(o_ref.dtype)


def patch_embedding_2d(x, weight, bias, patch_size, stride, flatten=True,
                       compute_dtype=None, tm_max=2048):
    """Pallas implementation of PatchEmbedding2D.forward.

    x:      (N, C, H, W)   NCHW, like PyTorch
    weight: (E, C, ph, pw) PyTorch Conv2d weight layout
    bias:   (E,)
    returns (N, Gh*Gw, E) if flatten else (N, Gh, Gw, E)
    """
    N, C, H, W = x.shape
    E = weight.shape[0]
    ph, pw = patch_size
    sh, sw = stride
    assert (ph, pw) == (sh, sw), "kernel assumes non-overlapping patches (stride == patch_size)"
    Gh = (H - ph) // sh + 1
    Gw = (W - pw) // sw + 1

    out_dtype = x.dtype
    if compute_dtype is None:
        # bf16 MXU inputs by default (halves HBM/VMEM traffic, full MXU rate);
        # accumulation stays f32 below.
        compute_dtype = jnp.bfloat16 if x.dtype == jnp.float32 else x.dtype

    # ---- glue: extract non-overlapping patches, flatten in (C, ph, pw) order.
    # (N, C, Gh, ph, Gw, pw) -> (N, Gh, Gw, C, ph, pw) -> (M, K).  With
    # allow_input_fusion below XLA may fuse this producer chain into the
    # kernel's input instead of materializing it in HBM.
    xp = x.reshape(N, C, Gh, ph, Gw, pw)
    xp = jnp.transpose(xp, (0, 2, 4, 1, 3, 5))
    patches = xp.reshape(N * Gh * Gw, C * ph * pw)

    w2d = weight.reshape(E, C * ph * pw).T            # (K, E)
    b2d = bias.reshape(1, E).astype(jnp.float32)      # bias added in f32

    M, K = patches.shape

    # ---- lane-dense padding: K (patch-tile lane dim) and E (output lane dim)
    K_pad = _round_up(K, 128)
    E_pad = _round_up(E, 128)
    if K_pad != K:
        patches = jnp.pad(patches, ((0, 0), (0, K_pad - K)))
        w2d = jnp.pad(w2d, ((0, K_pad - K), (0, 0)))
    if E_pad != E:
        w2d = jnp.pad(w2d, ((0, 0), (0, E_pad - E)))
        b2d = jnp.pad(b2d, ((0, 0), (0, E_pad - E)))

    patches = patches.astype(compute_dtype)
    w2d = w2d.astype(compute_dtype)

    cbytes = jnp.dtype(compute_dtype).itemsize
    obytes = jnp.dtype(out_dtype).itemsize
    w_bytes = K_pad * E_pad * cbytes

    # Resident weight/bias (constant index_map): single-buffer when big enough
    # to matter.  Streamed patch tiles: 3rd buffer hides the DMA when K is tiny.
    weight_bufs = 1 if w_bytes >= (1 << 20) else None
    want_in_bufs = 3 if K_pad <= 256 else 2

    # ---- generation-aware tile height: fit everything in ~75% of VMEM.
    budget = _vmem_budget_bytes()
    resident = (1 if weight_bufs == 1 else 2) * w_bytes + 2 * E_pad * 4
    per_row = want_in_bufs * K_pad * cbytes + 2 * E_pad * obytes
    headroom = 4 * 2**20
    tm_cap = max(8, (budget - resident - headroom) // per_row)
    tm_cap = int(min(tm_cap, tm_max))

    TM, M_pad = _choose_tm(M, tm_cap, granule=256)
    if M_pad != M:                                   # rare fallback path
        patches = jnp.pad(patches, ((0, M_pad - M), (0, 0)))
    num_tiles = M_pad // TM
    in_bufs = 3 if (want_in_bufs == 3 and num_tiles >= 3) else None

    vmem_limit = int(min(max(budget, 16 * 2**20), 100 * 2**20))

    cost = pl.CostEstimate(
        flops=2 * M_pad * K_pad * E_pad,
        transcendentals=0,
        bytes_accessed=(M_pad * K_pad * cbytes + K_pad * E_pad * cbytes
                        + E_pad * 4 + M_pad * E_pad * obytes),
    )

    out = pl.pallas_call(
        _patch_embed_kernel,
        out_shape=jax.ShapeDtypeStruct((M_pad, E_pad), out_dtype),
        grid=(num_tiles,),
        in_specs=[
            _block_spec((TM, K_pad), lambda i: (i, 0), in_bufs),         # streamed tiles
            _block_spec((K_pad, E_pad), lambda i: (0, 0), weight_bufs),  # resident weight
            _block_spec((1, E_pad), lambda i: (0, 0), weight_bufs),      # resident bias
        ],
        out_specs=pl.BlockSpec((TM, E_pad), lambda i: (i, 0)),
        compiler_params=pltpu.CompilerParams(
            dimension_semantics=("parallel",),        # megacore sharding on v7x
            vmem_limit_bytes=vmem_limit,
            allow_input_fusion=[True, False, False],  # fuse patch-extraction producer
        ),
        cost_estimate=cost,
    )(patches, w2d, b2d)

    if M_pad != M or E_pad != E:
        out = out[:M, :E]
    if flatten:
        return out.reshape(N, Gh * Gw, E)
    return out.reshape(N, Gh, Gw, E)


def init_params(key, in_channels, embed_dim, patch_size, dtype=jnp.float32):
    """Deterministic Conv2d-style init (kaiming-uniform like PyTorch default)."""
    kw, kb = jax.random.split(key)
    fan_in = in_channels * patch_size[0] * patch_size[1]
    bound_w = math.sqrt(1.0 / fan_in) * math.sqrt(3.0)   # kaiming_uniform(a=sqrt(5))
    weight = jax.random.uniform(
        kw, (embed_dim, in_channels, patch_size[0], patch_size[1]),
        minval=-bound_w, maxval=bound_w, dtype=dtype)
    bound_b = 1.0 / math.sqrt(fan_in)
    bias = jax.random.uniform(kb, (embed_dim,), minval=-bound_b, maxval=bound_b, dtype=dtype)
    return weight, bias


if __name__ == "__main__":
    # Small shapes consistent with the module's forward.
    batch = 2
    in_channels = 4
    tensor_hw = (16, 16)
    patch_size = (4, 4)
    stride = (4, 4)
    embed_dim = 32

    key = jax.random.PRNGKey(0)
    kx, kp = jax.random.split(key)
    x = jax.random.normal(kx, (batch, in_channels, *tensor_hw), dtype=jnp.float32)
    weight, bias = init_params(kp, in_channels, embed_dim, patch_size)

    # Pure-JAX conv reference (same semantics as nn.Conv2d + permute + flatten).
    ref = jax.lax.conv_general_dilated(
        x, weight, window_strides=stride, padding="VALID",
        dimension_numbers=("NCHW", "OIHW", "NCHW")) + bias[None, :, None, None]
    ref = jnp.transpose(ref, (0, 2, 3, 1)).reshape(batch, -1, embed_dim)

    # Explicit f32 MXU path: tight tolerance against the conv reference.
    fwd_f32 = jax.jit(functools.partial(
        patch_embedding_2d, patch_size=patch_size, stride=stride, flatten=True,
        compute_dtype=jnp.float32))
    out_f32 = jax.block_until_ready(fwd_f32(x, weight, bias))
    assert out_f32.shape == (batch, 16, embed_dim), out_f32.shape
    assert jnp.allclose(out_f32, ref, atol=1e-4, rtol=1e-4), \
        float(jnp.abs(out_f32 - ref).max())

    # Default path: bf16 MXU inputs + f32 accumulation -> looser tolerance.
    fwd = jax.jit(functools.partial(
        patch_embedding_2d, patch_size=patch_size, stride=stride, flatten=True))
    out = jax.block_until_ready(fwd(x, weight, bias))
    assert out.shape == (batch, 16, embed_dim), out.shape
    assert out.dtype == x.dtype, out.dtype
    assert jnp.allclose(out.astype(jnp.float32), ref, atol=2e-1, rtol=5e-2), \
        float(jnp.abs(out.astype(jnp.float32) - ref).max())

    # Non-flattened path keeps the (N, Gh, Gw, E) grid layout.
    out_grid = jax.block_until_ready(jax.jit(functools.partial(
        patch_embedding_2d, patch_size=patch_size, stride=stride,
        flatten=False))(x, weight, bias))
    assert out_grid.shape == (batch, 4, 4, embed_dim), out_grid.shape

    print("KERNEL_OK")
</pallas_src>

<mosaic_0001>
module attributes {stable_mosaic.version = 11 : i64} {
  func.func @_patch_embed_kernel(%arg0: i32, %arg1: memref<32x128xf32, #tpu.memory_space<vmem>>, %arg2: memref<128x128xf32, #tpu.memory_space<vmem>>, %arg3: memref<1x128xf32, #tpu.memory_space<vmem>>, %arg4: memref<32x128xf32, #tpu.memory_space<vmem>>) attributes {dimension_semantics = [#tpu.dimension_semantics<parallel>], iteration_bounds = array<i64: 1>, scalar_prefetch = 0 : i64, scratch_operands = 0 : i64, tpu.core_type = #tpu.core_type<tc>, window_params = [{transform_indices = @transform_0, window_bounds = array<i64: 32, 128>}, {pipeline_mode = #tpu.pipeline_mode<synchronous>, transform_indices = @transform_1, window_bounds = array<i64: 128, 128>}, {pipeline_mode = #tpu.pipeline_mode<synchronous>, transform_indices = @transform_2, window_bounds = array<i64: 1, 128>}, {transform_indices = @transform_3, window_bounds = array<i64: 32, 128>}]} {
    %c0 = arith.constant 0 : index
    %c0_0 = arith.constant 0 : index
    %0 = vector.load %arg1[%c0, %c0_0] : memref<32x128xf32, #tpu.memory_space<vmem>>, vector<32x128xf32>
    %c0_1 = arith.constant 0 : index
    %c0_2 = arith.constant 0 : index
    %1 = vector.load %arg2[%c0_1, %c0_2] : memref<128x128xf32, #tpu.memory_space<vmem>>, vector<128x128xf32>
    %cst = arith.constant dense<0.000000e+00> : vector<32x128xf32>
    %2 = tpu.matmul %0, %1, %cst {dimension_numbers = #tpu.dot_dimension_numbers<[1], [0], [0], [1], [0, 0, 1, 1], [], []>} : vector<32x128xf32>, vector<128x128xf32>, vector<32x128xf32> -> vector<32x128xf32>
    %c0_3 = arith.constant 0 : index
    %c0_4 = arith.constant 0 : index
    %3 = vector.load %arg3[%c0_3, %c0_4] : memref<1x128xf32, #tpu.memory_space<vmem>>, vector<1x128xf32>
    %4 = vector.broadcast %3 : vector<1x128xf32> to vector<32x128xf32>
    %5 = arith.addf %2, %4 : vector<32x128xf32>
    %c0_5 = arith.constant 0 : index
    %c0_6 = arith.constant 0 : index
    %6 = vector.load %arg4[%c0_5, %c0_6] : memref<32x128xf32, #tpu.memory_space<vmem>>, vector<32x128xf32>
    tpu.vector_store %arg4[%c0_5, %c0_6], %5 {strides = array<i32>} : memref<32x128xf32, #tpu.memory_space<vmem>>, vector<32x128xf32>,
    return
  }
  func.func @transform_0(%arg0: i32) -> (i32, i32) {
    %c0_i32 = arith.constant 0 : i32
    %c0_i32_0 = arith.constant 0 : i32
    return %arg0, %c0_i32 : i32, i32
  }
  func.func @transform_1(%arg0: i32) -> (i32, i32) {
    %c0_i32 = arith.constant 0 : i32
    %c0_i32_0 = arith.constant 0 : i32
    %c0_i32_1 = arith.constant 0 : i32
    return %c0_i32, %c0_i32_0 : i32, i32
  }
  func.func @transform_2(%arg0: i32) -> (i32, i32) {
    %c0_i32 = arith.constant 0 : i32
    %c0_i32_0 = arith.constant 0 : i32
    %c0_i32_1 = arith.constant 0 : i32
    return %c0_i32, %c0_i32_0 : i32, i32
  }
  func.func @transform_3(%arg0: i32) -> (i32, i32) {
    %c0_i32 = arith.constant 0 : i32
    %c0_i32_0 = arith.constant 0 : i32
    return %arg0, %c0_i32 : i32, i32
  }
}

</mosaic_0001>

<bundles_post_ra>
// kernel: patch_embedding_2d.2
= control target key start
LH: loop header
LB: loop body
LE: loop exit
PB: predicated region body
PF: predicated region fallthrough
CT: control target
= control target key end

     0   :  { %s440_s0 = inlined_call_operand.vmem [shape: f32[128,128], index: 0, kind: input, shape index: {}]   ;;  %s441_s1 = inlined_call_operand.vmem [shape: f32[1,128], index: 1, kind: input, shape index: {}]   ;;  %s442_s2 = inlined_call_operand.vmem [shape: f32[32,64], index: 2, kind: input, shape index: {}]   ;;  %s443_s3 = inlined_call_operand.<no memory space> [shape: f32[], index: 3, kind: input, shape index: {}]   ;;  %s444_s4 = inlined_call_operand.hbm [shape: f32[32,128], index: 4, kind: output, shape index: {}]  }
   0x1   :  { %v355_v0 = vstv %s443_s3 }
   0x2   :  { %v59_v1 = vld [vmem:[%s440_s0] sm:$0xff]  ;;  %v60_v2 = vld [vmem:[%s440_s0 + $0x8] sm:$0xff]  ;;  %v61_v3 = vld [vmem:[%s440_s0 + $0x10] sm:$0xff]  ;;  %v18_v4 = vlaneseq }
   0x3   :  { %v249_v5 = vpack.c.bf16 %v60_v2, %v59_v1  ;;  %v62_v6 = vld [vmem:[%s440_s0 + $0x18] sm:$0xff]  ;;  %v63_v8 = vld [vmem:[%s440_s0 + $0x20] sm:$0xff]  ;;  %v64_v9 = vld [vmem:[%s440_s0 + $0x28] sm:$0xff] }
   0x4   :  { %v253_v7 = vpack.c.bf16 %v62_v6, %v61_v3  ;;  %v19_v10 = vand.u32 127, %v18_v4  ;;  %v257_v11 = vpack.c.bf16 %v64_v9, %v63_v8  ;;  %v17_v12 = vld [vmem:[%s442_s2] sm:$0xff]  ;;  %v188_v13 = vld [vmem:[%s442_s2 + $0x10] sm:$0xff]  ;;  %v66_v15 = vld [vmem:[%s440_s0 + $0x38] sm:$0xff] }
   0x5   :  { %250 = vmatprep.subr.bf16.mxu0 %v249_v5  ;;  %281 = vmatprep.subr.bf16.mxu1 %v249_v5  ;;  %v65_v14 = vld [vmem:[%s440_s0 + $0x30] sm:$0xff] }
   0x6   :  { %252 = vmatpush3.bf16.msra.mxu0 %v249_v5  ;;  %289 = vmatpush3.bf16.msra.mxu1 %v249_v5  ;;  %vm21_vm0 = vcmp.lt.s32.totalorder %v19_v10, 64 }
   0x7   :  { %254 = vmatprep.subr.bf16.mxu0 %v253_v7  ;;  %282 = vmatprep.subr.bf16.mxu1 %v253_v7  ;;  %v22_v16 = vsel %vm21_vm0, %v17_v12, %v355_v0  ;;  %v41_v17 = vsel %vm21_vm0, %v188_v13, %v355_v0 }
   0x8   :  { %10 = vsyncpa [#allocation8], 0  ;;  %243 = vmatprep.mubr.f32.mxu0 %v22_v16  ;;  %246 = vmatprep.mubr.f32.mxu1 %v41_v17  ;;  %v261_v18 = vpack.c.bf16 %v66_v15, %v65_v14  ;;  %v67_v19 = vld [vmem:[%s440_s0 + $0x40] sm:$0xff]  ;;  %v68_v20 = vld [vmem:[%s440_s0 + $0x48] sm:$0xff]  ;;  %s324_s30 = smov [#allocation7]  }
   0x9   :  { %v265_v21 = vpack.c.bf16 %v68_v20, %v67_v19  ;;  %v69_v22 = vld [vmem:[%s440_s0 + $0x50] sm:$0xff]  ;;  %v70_v23 = vld [vmem:[%s440_s0 + $0x58] sm:$0xff]  ;;  %v71_v25 = vld [vmem:[%s440_s0 + $0x60] sm:$0xff]  ;;  %s176_s5 = sshll.u32 %s324_s30, 4  ;;  %s177_s5 = int_to_ptr.vmem [resolvable:$true] %s176_s5 }
   0xa   :  { %256 = vmatpush3.bf16.msra.mxu0 %v253_v7  ;;  %290 = vmatpush3.bf16.msra.mxu1 %v253_v7  ;;  %v269_v24 = vpack.c.bf16 %v70_v23, %v69_v22  ;;  %v72_v26 = vld [vmem:[%s440_s0 + $0x68] sm:$0xff]  ;;  %v73_v28 = vld [vmem:[%s440_s0 + $0x70] sm:$0xff]  ;;  %v74_v29 = vld [vmem:[%s440_s0 + $0x78] sm:$0xff]  ;;  %p305_p1 = scmp.lt.s32.totalorder %s177_s5, %s177_s5 }
   0xb   :  { %258 = vmatprep.subr.bf16.mxu0 %v257_v11  ;;  %283 = vmatprep.subr.bf16.mxu1 %v257_v11  ;;  %v273_v27 = vpack.c.bf16 %v72_v26, %v71_v25  ;;  %v277_v30 = vpack.c.bf16 %v74_v29, %v73_v28  ;;  %v187_v31 = vld [vmem:[%s442_s2 + $0x8] sm:$0xff]  ;;  %v189_v32 = vld [vmem:[%s442_s2 + $0x18] sm:$0xff]  ;;  %v190_v35 = vld [vmem:[%s441_s1] ss:$0 sm:$0xff]  ;;  %s300_s2 = scalar_lea.vmem %s177_s5, 512 }
   0xc   :  { %v31_v33 = vsel %vm21_vm0, %v187_v31, %v355_v0  ;;  %v51_v34 = vsel %vm21_vm0, %v189_v32, %v355_v0  ;;  %p301_p0 = scmp.ne.s32.totalorder %s177_s5, %s300_s2  ;;  %p306_p2 = scmp.lt.s32.totalorder %s300_s2, %s300_s2 }
   0xe   :  { %260 = vmatpush3.bf16.msra.mxu0 %v257_v11  ;;  %291 = vmatpush3.bf16.msra.mxu1 %v257_v11  ;;  %p307_p3 = por %p306_p2, %p305_p1 }
   0xf   :  { %262 = vmatprep.subr.bf16.mxu0 %v261_v18  ;;  %284 = vmatprep.subr.bf16.mxu1 %v261_v18 }
  0x10   :  { %p308_p4 = pnand %p307_p3, %p301_p0 }
  0x12   :  { %264 = vmatpush3.bf16.msra.mxu0 %v261_v18  ;;  %292 = vmatpush3.bf16.msra.mxu1 %v261_v18 }
  0x13   :  { %266 = vmatprep.subr.bf16.mxu0 %v265_v21  ;;  %285 = vmatprep.subr.bf16.mxu1 %v265_v21 }
  0x16   :  { %268 = vmatpush3.bf16.msra.mxu0 %v265_v21  ;;  %293 = vmatpush3.bf16.msra.mxu1 %v265_v21 }
  0x17   :  { %270 = vmatprep.subr.bf16.mxu0 %v269_v24  ;;  %286 = vmatprep.subr.bf16.mxu1 %v269_v24 }
  0x1a   :  { %272 = vmatpush3.bf16.msra.mxu0 %v269_v24  ;;  %294 = vmatpush3.bf16.msra.mxu1 %v269_v24 }
  0x1b   :  { %274 = vmatprep.subr.bf16.mxu0 %v273_v27  ;;  %287 = vmatprep.subr.bf16.mxu1 %v273_v27 }
  0x1e   :  { %276 = vmatpush3.bf16.msra.mxu0 %v273_v27  ;;  %295 = vmatpush3.bf16.msra.mxu1 %v273_v27 }
  0x1f   :  { %278 = vmatprep.subr.bf16.mxu0 %v277_v30  ;;  %288 = vmatprep.subr.bf16.mxu1 %v277_v30 }
  0x22   :  { %280 = vmatpush3.bf16.msra.mxu0 %v277_v30  ;;  %296 = vmatpush3.bf16.msra.mxu1 %v277_v30 }
  0x25   :  { %244 = vmatmul.mubr.f32.vlgmr.msra.gmra.mrb[0].mxu0 %v31_v33  ;;  %247 = vmatmul.mubr.f32.vlgmr.msra.gmra.mrb[0].mxu1 %v51_v34 }
  0xf8   :  { %v245_v36 = vpop.f32.mrb[0].mxu0  ;;  %v248_v37 = vpop.f32.mrb[0].mxu1 }
  0xf9   :  { %v154_v38 = vadd.f32 %v245_v36, %v190_v35  ;;  %v164_v39 = vadd.f32 %v248_v37, %v190_v35  ;;  %v148_v40 = vpop.f32.mrb[1].mxu0  ;;  %v158_v41 = vpop.f32.mrb[1].mxu1 }
  0xfa   :  { %v149_v42 = vadd.f32 %v190_v35, %v148_v40  ;;  %v159_v43 = vadd.f32 %v190_v35, %v158_v41 }
  0xfb   :  { %168 = vst [vmem:[#allocation7 + $0x8] sm:$0xff] %v154_v38  ;;  %170 = vst [vmem:[#allocation7 + $0x18] sm:$0xff] %v164_v39 }
  0xfc   :  { %167 = vst [vmem:[#allocation7] sm:$0xff] %v149_v42  ;;  %169 = vst [vmem:[#allocation7 + $0x10] sm:$0xff] %v159_v43 }
  0xfd   :  { %311 = shalt.err (!%p308_p4)
}
  0xfe   :  { %s312_s7 = scalar_lea.hbm %s444_s4, 512 }
  0xff   :  { %p313_p5 = scmp.ne.s32.totalorder %s444_s4, %s312_s7  ;;  %p316_p6 = scmp.lt.u32.totalorder %s312_s7, %s444_s4 }
 0x101   :  { %p318_p7 = pnand %p316_p6, %p313_p5 }
 0x103   :  { %321 = shalt.err (!%p318_p7)
}
 0x104   :  { %s325_s12 = smov 128   ;;  %s326_s13 = smov 8  }
 0x105   :  { %182 = dma.vmem_to_hbm [thread:$0]  %s177_s5, 512, %s444_s4, [#allocation8], %s325_s12, %s325_s12, %s326_s13  }
 0x106   :  { %322 = dma.done.wait [#allocation8], 512  }
 0x107   :  { %323 = vsyncadd [#allocation8], 4294966784 }
 0x108   :  { %186 = vsyncpa [#allocation8], 1 }

</bundles_post_ra>
